<compile_context>
chip_gen: v7x
topology: tpu7x:2x2x1
jax: 0.10.0
libtpu: 0.0.40
codegen_flags: <defaults>
</compile_context>

<pallas_src>
import functools

import jax
import jax.numpy as jnp
import numpy as np
from jax import lax
from jax.experimental import pallas as pl
from jax.experimental.pallas import tpu as pltpu


def _fused_kernel(x_ref, *refs, plan, slope):
    """One grid program = one period column (n = b*period + p) through ALL layers.

    refs layout (positional): [w_0..w_{L-1}, b_0..b_{L-1},   # inputs  (shared weights)
                               act_0..act_{L-1},             # outputs (per-column blocks)
                               pad_0..pad_{L-1}]             # VMEM scratch (padded bufs)
    plan[l] = (ksize, stride, h_in, h_out, c_in, c_out, apply_relu) -- all static.
    Layout: time on sublanes, channels on lanes.  Weights are shared across columns
    (no block-diagonal replication).
    """
    L = len(plan)
    w_refs = refs[0:L]
    b_refs = refs[L:2 * L]
    act_refs = refs[2 * L:3 * L]
    pad_refs = refs[3 * L:4 * L]

    y = x_ref[0]                                           # (H0, 1) f32
    for li, (ksize, stride, h_in, h_out, c_in, c_out, apply_relu) in enumerate(plan):
        pad = ksize // 2
        pref = pad_refs[li]                                # (h_in + 2*pad, c_in)
        # Zero only the halo rows; the payload store covers the middle (review item).
        zeros = jnp.zeros((pad, c_in), dtype=pref.dtype)
        pref[pl.ds(0, pad), :] = zeros
        pref[pl.ds(pad + h_in, pad), :] = zeros
        pref[pl.ds(pad, h_in), :] = y
        # K unrolled accumulating contractions against the SHARED per-tap weight.
        acc = None
        for k in range(ksize):                             # static unroll over taps
            if stride == 1:
                tap = pref[pl.ds(k, h_out), :]
            else:
                tap = pref[pl.ds(k, h_out, stride), :]     # strided sublane load
            wk = w_refs[li][k]                             # (c_in, c_out)
            if c_in == 1:
                contrib = tap * wk                         # (h_out,1)*(1,c_out): VPU
            else:
                contrib = jnp.dot(tap, wk, preferred_element_type=jnp.float32)
            acc = contrib if acc is None else acc + contrib
        acc = acc + b_refs[li][...]                        # (1, c_out) bias broadcast
        if apply_relu:
            acc = jnp.maximum(acc, slope * acc)            # LeakyReLU (single VPU max)
        act_refs[li][0] = acc.astype(act_refs[li].dtype)
        y = acc


# ----------------------------- parameters (deterministic) -----------------------------

def weight_norm_effective(v, g):
    # torch weight_norm (dim=0): w = g * v / ||v||, norm over dims (1,2,3)
    norm = jnp.sqrt(jnp.sum(v * v, axis=(1, 2, 3), keepdims=True))
    return g * v / norm


def init_params(key, channels, kernel_size):
    chans = [1] + list(channels)
    conv_params = []
    for cin, cout in zip(chans[:-1], chans[1:]):
        key, kv, kg, kb = jax.random.split(key, 4)
        v = 0.2 * jax.random.normal(kv, (cout, cin, kernel_size, 1), jnp.float32)
        g = 1.0 + 0.1 * jax.random.normal(kg, (cout, 1, 1, 1), jnp.float32)
        bias = 0.1 * jax.random.normal(kb, (cout,), jnp.float32)
        conv_params.append((weight_norm_effective(v, g), bias))
    key, kv, kg, kb = jax.random.split(key, 4)
    cin = chans[-1]
    v = 0.2 * jax.random.normal(kv, (1, cin, 3, 1), jnp.float32)
    g = 1.0 + 0.1 * jax.random.normal(kg, (1, 1, 1, 1), jnp.float32)
    bias = 0.1 * jax.random.normal(kb, (1,), jnp.float32)
    collapse_params = (weight_norm_effective(v, g), bias)
    return conv_params, collapse_params


# ----------------------------------- forward pass --------------------------------------

def period_discriminator_forward(x, conv_params, collapse_params, *, period, stride, slope):
    b, t = x.shape
    if t % period != 0:
        n_pad = period - t % period
        x = jnp.pad(x, ((0, 0), (0, n_pad)), mode="reflect")   # torch reflect pad (right)
        t += n_pad
    h0 = t // period
    n = b * period
    # Column-ordering contract (shared with the activation unpack below):
    #   column index nn = bb*period + p, and xk[nn, h, 0] = x[bb, h*period + p].
    xk = x.reshape(b, h0, period).transpose(0, 2, 1).reshape(n, h0, 1)

    layers = [(w, bias, stride, True) for (w, bias) in conv_params]
    w_c, b_c = collapse_params
    layers.append((w_c, b_c, 1, False))

    plan, w_in, b_in = [], [], []
    h_in = h0
    for w, bias, s, relu in layers:
        c_out, c_in, ksize, _ = w.shape
        pad = ksize // 2
        h_out = (h_in + 2 * pad - ksize) // s + 1
        plan.append((int(ksize), int(s), int(h_in), int(h_out),
                     int(c_in), int(c_out), bool(relu)))
        # (C_out, C_in, K, 1) -> per-tap shared weight (K, C_in, C_out).  No block-diag.
        w_in.append(jnp.transpose(w[:, :, :, 0], (2, 1, 0)))
        b_in.append(bias.reshape(1, int(c_out)))
        h_in = h_out

    out_shapes = tuple(jax.ShapeDtypeStruct((n, p[3], p[5]), jnp.float32) for p in plan)
    # Per-column padded scratch per layer (only one column resident per program).
    scratch = [pltpu.VMEM((p[2] + 2 * (p[0] // 2), p[4]), jnp.float32) for p in plan]

    in_specs = ([pl.BlockSpec((1, h0, 1), lambda i: (i, 0, 0))] +
                [pl.BlockSpec(w.shape, lambda i: (0, 0, 0)) for w in w_in] +
                [pl.BlockSpec(bb.shape, lambda i: (0, 0)) for bb in b_in])
    out_specs = tuple(pl.BlockSpec((1, p[3], p[5]), lambda i: (i, 0, 0)) for p in plan)

    flops = 0
    bytes_accessed = xk.size * 4
    for (ksize, s, hi, ho, ci, co, relu) in plan:
        flops += 2 * n * ho * ksize * ci * co
        bytes_accessed += 4 * (ksize * ci * co + co + n * ho * co)
    cost = pl.CostEstimate(flops=int(flops), transcendentals=0,
                           bytes_accessed=int(bytes_accessed))

    outs = pl.pallas_call(
        functools.partial(_fused_kernel, plan=tuple(plan), slope=slope),
        out_shape=out_shapes,
        grid=(n,),
        in_specs=in_specs,
        out_specs=out_specs,
        scratch_shapes=scratch,
        compiler_params=pltpu.CompilerParams(
            dimension_semantics=("parallel",),
            vmem_limit_bytes=32 * 1024 * 1024),
        cost_estimate=cost,
    )(xk, *w_in, *b_in)

    # Kernel layout (N, H, C) -> PyTorch NCHW (B, C, H, P).  Tiny host glue; required
    # only because the module API returns NCHW activation tensors.
    activations = []
    for p, a in zip(plan, outs):
        activations.append(a.reshape(b, period, p[3], p[5]).transpose(0, 3, 2, 1))

    # Final per-batch mean over (H_last, P) of the (already returned) collapse output.
    # Kept host-side (B*P*H_last scalars) so the grid axis stays "parallel".
    h_last = plan[-1][3]
    score = outs[-1].reshape(b, period * h_last).mean(axis=1)
    return score, activations


# ------------------------------ pure-JAX reference check -------------------------------

def reference_forward(x, conv_params, collapse_params, *, period, stride, slope):
    b, t = x.shape
    if t % period != 0:
        x = jnp.pad(x, ((0, 0), (0, period - t % period)), mode="reflect")
    xr = x.reshape(b, 1, -1, period)
    acts = []
    for w, bias in conv_params:
        pad = w.shape[2] // 2
        xr = lax.conv_general_dilated(xr, w, (stride, 1), ((pad, pad), (0, 0)),
                                      dimension_numbers=("NCHW", "OIHW", "NCHW"),
                                      precision=lax.Precision.HIGHEST)
        xr = xr + bias[None, :, None, None]
        xr = jnp.where(xr > 0, xr, slope * xr)
        acts.append(xr)
    w, bias = collapse_params
    pad = w.shape[2] // 2
    xr = lax.conv_general_dilated(xr, w, (1, 1), ((pad, pad), (0, 0)),
                                  dimension_numbers=("NCHW", "OIHW", "NCHW"),
                                  precision=lax.Precision.HIGHEST)
    xr = xr + bias[None, :, None, None]
    acts.append(xr)
    return xr.reshape(b, -1).mean(axis=1), acts


if __name__ == "__main__":
    period, kernel_size, stride, slope = 4, 5, 3, 0.1
    channels = [4, 8, 16]
    batch, t = 2, 126     # 126 % 4 != 0 -> exercises the reflect-pad branch

    key = jax.random.PRNGKey(0)
    key, kx, kp = jax.random.split(key, 3)
    x = jax.random.normal(kx, (batch, t), jnp.float32)
    conv_params, collapse_params = init_params(kp, channels, kernel_size)

    fwd = jax.jit(functools.partial(period_discriminator_forward,
                                    period=period, stride=stride, slope=slope))
    score, acts = fwd(x, conv_params, collapse_params)
    score = jax.block_until_ready(score)
    acts = jax.block_until_ready(acts)

    ref_score, ref_acts = reference_forward(
        x, conv_params, collapse_params, period=period, stride=stride, slope=slope)

    assert len(acts) == len(ref_acts)
    for a, r in zip(acts, ref_acts):
        assert a.shape == r.shape, (a.shape, r.shape)
        np.testing.assert_allclose(np.asarray(a), np.asarray(r), rtol=1e-2, atol=1e-3)
    np.testing.assert_allclose(np.asarray(score), np.asarray(ref_score),
                               rtol=1e-2, atol=1e-3)

    print("KERNEL_OK")
</pallas_src>

<mosaic_0001>
module attributes {stable_mosaic.version = 11 : i64} {
  func.func @_fused_kernel(%arg0: i32, %arg1: memref<1x32x1xf32, #tpu.memory_space<vmem>>, %arg2: memref<5x1x4xf32, #tpu.memory_space<vmem>>, %arg3: memref<5x4x8xf32, #tpu.memory_space<vmem>>, %arg4: memref<5x8x16xf32, #tpu.memory_space<vmem>>, %arg5: memref<3x16x1xf32, #tpu.memory_space<vmem>>, %arg6: memref<1x4xf32, #tpu.memory_space<vmem>>, %arg7: memref<1x8xf32, #tpu.memory_space<vmem>>, %arg8: memref<1x16xf32, #tpu.memory_space<vmem>>, %arg9: memref<1x1xf32, #tpu.memory_space<vmem>>, %arg10: memref<1x11x4xf32, #tpu.memory_space<vmem>>, %arg11: memref<1x4x8xf32, #tpu.memory_space<vmem>>, %arg12: memref<1x2x16xf32, #tpu.memory_space<vmem>>, %arg13: memref<1x2x1xf32, #tpu.memory_space<vmem>>, %arg14: memref<36x1xf32, #tpu.memory_space<vmem>>, %arg15: memref<15x4xf32, #tpu.memory_space<vmem>>, %arg16: memref<8x8xf32, #tpu.memory_space<vmem>>, %arg17: memref<4x16xf32, #tpu.memory_space<vmem>>) attributes {dimension_semantics = [#tpu.dimension_semantics<parallel>], iteration_bounds = array<i64: 8>, scalar_prefetch = 0 : i64, scratch_operands = 4 : i64, tpu.core_type = #tpu.core_type<tc>, window_params = [{transform_indices = @transform_0, window_bounds = array<i64: 1, 32, 1>}, {pipeline_mode = #tpu.pipeline_mode<synchronous>, transform_indices = @transform_1, window_bounds = array<i64: 5, 1, 4>}, {pipeline_mode = #tpu.pipeline_mode<synchronous>, transform_indices = @transform_2, window_bounds = array<i64: 5, 4, 8>}, {pipeline_mode = #tpu.pipeline_mode<synchronous>, transform_indices = @transform_3, window_bounds = array<i64: 5, 8, 16>}, {pipeline_mode = #tpu.pipeline_mode<synchronous>, transform_indices = @transform_4, window_bounds = array<i64: 3, 16, 1>}, {pipeline_mode = #tpu.pipeline_mode<synchronous>, transform_indices = @transform_5, window_bounds = array<i64: 1, 4>}, {pipeline_mode = #tpu.pipeline_mode<synchronous>, transform_indices = @transform_6, window_bounds = array<i64: 1, 8>}, {pipeline_mode = #tpu.pipeline_mode<synchronous>, transform_indices = @transform_7, window_bounds = array<i64: 1, 16>}, {pipeline_mode = #tpu.pipeline_mode<synchronous>, transform_indices = @transform_8, window_bounds = array<i64: 1, 1>}, {transform_indices = @transform_9, window_bounds = array<i64: 1, 11, 4>}, {transform_indices = @transform_10, window_bounds = array<i64: 1, 4, 8>}, {transform_indices = @transform_11, window_bounds = array<i64: 1, 2, 16>}, {transform_indices = @transform_12, window_bounds = array<i64: 1, 2, 1>}]} {
    %c0 = arith.constant 0 : index
    %c0_0 = arith.constant 0 : index
    %c0_1 = arith.constant 0 : index
    %0 = vector.load %arg1[%c0, %c0_0, %c0_1] : memref<1x32x1xf32, #tpu.memory_space<vmem>>, vector<1x32x1xf32>
    %1 = vector.shape_cast %0 : vector<1x32x1xf32> to vector<32x1xf32>
    %cst = arith.constant 0.000000e+00 : f32
    %2 = vector.broadcast %cst : f32 to vector<2x1xf32>
    %c0_2 = arith.constant 0 : index
    %c0_3 = arith.constant 0 : index
    %3 = vector.load %arg14[%c0_2, %c0_3] : memref<36x1xf32, #tpu.memory_space<vmem>>, vector<2x1xf32>
    tpu.vector_store %arg14[%c0_2, %c0_3], %2 {strides = array<i32>} : memref<36x1xf32, #tpu.memory_space<vmem>>, vector<2x1xf32>,
    %c34 = arith.constant 34 : index
    %c0_4 = arith.constant 0 : index
    %4 = vector.load %arg14[%c34, %c0_4] : memref<36x1xf32, #tpu.memory_space<vmem>>, vector<2x1xf32>
    tpu.vector_store %arg14[%c34, %c0_4], %2 {strides = array<i32>} : memref<36x1xf32, #tpu.memory_space<vmem>>, vector<2x1xf32>,
    %c2 = arith.constant 2 : index
    %c0_5 = arith.constant 0 : index
    %5 = vector.load %arg14[%c2, %c0_5] : memref<36x1xf32, #tpu.memory_space<vmem>>, vector<32x1xf32>
    tpu.vector_store %arg14[%c2, %c0_5], %1 {strides = array<i32>} : memref<36x1xf32, #tpu.memory_space<vmem>>, vector<32x1xf32>,
    %c0_6 = arith.constant 0 : index
    %c0_7 = arith.constant 0 : index
    %6 = tpu.strided_load %arg14[%c0_6, %c0_7] {strides = array<i32: 3, 1>} : memref<36x1xf32, #tpu.memory_space<vmem>>, vector<11x1xf32>
    %c0_8 = arith.constant 0 : index
    %c0_9 = arith.constant 0 : index
    %c0_10 = arith.constant 0 : index
    %7 = vector.load %arg2[%c0_8, %c0_9, %c0_10] : memref<5x1x4xf32, #tpu.memory_space<vmem>>, vector<1x1x4xf32>
    %8 = vector.shape_cast %7 : vector<1x1x4xf32> to vector<1x4xf32>
    %9 = vector.broadcast %6 : vector<11x1xf32> to vector<11x4xf32>
    %10 = vector.broadcast %8 : vector<1x4xf32> to vector<11x4xf32>
    %11 = arith.mulf %9, %10 : vector<11x4xf32>
    %c1 = arith.constant 1 : index
    %c0_11 = arith.constant 0 : index
    %12 = tpu.strided_load %arg14[%c1, %c0_11] {strides = array<i32: 3, 1>} : memref<36x1xf32, #tpu.memory_space<vmem>>, vector<11x1xf32>
    %c1_12 = arith.constant 1 : index
    %c0_13 = arith.constant 0 : index
    %c0_14 = arith.constant 0 : index
    %13 = vector.load %arg2[%c1_12, %c0_13, %c0_14] : memref<5x1x4xf32, #tpu.memory_space<vmem>>, vector<1x1x4xf32>
    %14 = vector.shape_cast %13 : vector<1x1x4xf32> to vector<1x4xf32>
    %15 = vector.broadcast %12 : vector<11x1xf32> to vector<11x4xf32>
    %16 = vector.broadcast %14 : vector<1x4xf32> to vector<11x4xf32>
    %17 = arith.mulf %15, %16 : vector<11x4xf32>
    %18 = arith.addf %11, %17 : vector<11x4xf32>
    %c2_15 = arith.constant 2 : index
    %c0_16 = arith.constant 0 : index
    %19 = tpu.strided_load %arg14[%c2_15, %c0_16] {strides = array<i32: 3, 1>} : memref<36x1xf32, #tpu.memory_space<vmem>>, vector<11x1xf32>
    %c2_17 = arith.constant 2 : index
    %c0_18 = arith.constant 0 : index
    %c0_19 = arith.constant 0 : index
    %20 = vector.load %arg2[%c2_17, %c0_18, %c0_19] : memref<5x1x4xf32, #tpu.memory_space<vmem>>, vector<1x1x4xf32>
    %21 = vector.shape_cast %20 : vector<1x1x4xf32> to vector<1x4xf32>
    %22 = vector.broadcast %19 : vector<11x1xf32> to vector<11x4xf32>
    %23 = vector.broadcast %21 : vector<1x4xf32> to vector<11x4xf32>
    %24 = arith.mulf %22, %23 : vector<11x4xf32>
    %25 = arith.addf %18, %24 : vector<11x4xf32>
    %c3 = arith.constant 3 : index
    %c0_20 = arith.constant 0 : index
    %26 = tpu.strided_load %arg14[%c3, %c0_20] {strides = array<i32: 3, 1>} : memref<36x1xf32, #tpu.memory_space<vmem>>, vector<11x1xf32>
    %c3_21 = arith.constant 3 : index
    %c0_22 = arith.constant 0 : index
    %c0_23 = arith.constant 0 : index
    %27 = vector.load %arg2[%c3_21, %c0_22, %c0_23] : memref<5x1x4xf32, #tpu.memory_space<vmem>>, vector<1x1x4xf32>
    %28 = vector.shape_cast %27 : vector<1x1x4xf32> to vector<1x4xf32>
    %29 = vector.broadcast %26 : vector<11x1xf32> to vector<11x4xf32>
    %30 = vector.broadcast %28 : vector<1x4xf32> to vector<11x4xf32>
    %31 = arith.mulf %29, %30 : vector<11x4xf32>
    %32 = arith.addf %25, %31 : vector<11x4xf32>
    %c4 = arith.constant 4 : index
    %c0_24 = arith.constant 0 : index
    %33 = tpu.strided_load %arg14[%c4, %c0_24] {strides = array<i32: 3, 1>} : memref<36x1xf32, #tpu.memory_space<vmem>>, vector<11x1xf32>
    %c4_25 = arith.constant 4 : index
    %c0_26 = arith.constant 0 : index
    %c0_27 = arith.constant 0 : index
    %34 = vector.load %arg2[%c4_25, %c0_26, %c0_27] : memref<5x1x4xf32, #tpu.memory_space<vmem>>, vector<1x1x4xf32>
    %35 = vector.shape_cast %34 : vector<1x1x4xf32> to vector<1x4xf32>
    %36 = vector.broadcast %33 : vector<11x1xf32> to vector<11x4xf32>
    %37 = vector.broadcast %35 : vector<1x4xf32> to vector<11x4xf32>
    %38 = arith.mulf %36, %37 : vector<11x4xf32>
    %39 = arith.addf %32, %38 : vector<11x4xf32>
    %c0_28 = arith.constant 0 : index
    %c0_29 = arith.constant 0 : index
    %40 = vector.load %arg6[%c0_28, %c0_29] : memref<1x4xf32, #tpu.memory_space<vmem>>, vector<1x4xf32>
    %41 = vector.broadcast %40 : vector<1x4xf32> to vector<11x4xf32>
    %42 = arith.addf %39, %41 : vector<11x4xf32>
    %cst_30 = arith.constant 1.000000e-01 : f32
    %43 = vector.broadcast %cst_30 : f32 to vector<11x4xf32>
    %44 = arith.mulf %43, %42 : vector<11x4xf32>
    %45 = arith.maximumf %42, %44 : vector<11x4xf32>
    %c0_31 = arith.constant 0 : index
    %c0_32 = arith.constant 0 : index
    %c0_33 = arith.constant 0 : index
    %46 = vector.load %arg10[%c0_31, %c0_32, %c0_33] : memref<1x11x4xf32, #tpu.memory_space<vmem>>, vector<1x11x4xf32>
    %47 = vector.shape_cast %46 : vector<1x11x4xf32> to vector<11x4xf32>
    %48 = vector.shape_cast %45 : vector<11x4xf32> to vector<1x11x4xf32>
    tpu.vector_store %arg10[%c0_31, %c0_32, %c0_33], %48 {strides = array<i32>} : memref<1x11x4xf32, #tpu.memory_space<vmem>>, vector<1x11x4xf32>,
    %cst_34 = arith.constant 0.000000e+00 : f32
    %49 = vector.broadcast %cst_34 : f32 to vector<2x4xf32>
    %c0_35 = arith.constant 0 : index
    %c0_36 = arith.constant 0 : index
    %50 = vector.load %arg15[%c0_35, %c0_36] : memref<15x4xf32, #tpu.memory_space<vmem>>, vector<2x4xf32>
    tpu.vector_store %arg15[%c0_35, %c0_36], %49 {strides = array<i32>} : memref<15x4xf32, #tpu.memory_space<vmem>>, vector<2x4xf32>,
    %c13 = arith.constant 13 : index
    %c0_37 = arith.constant 0 : index
    %51 = vector.load %arg15[%c13, %c0_37] : memref<15x4xf32, #tpu.memory_space<vmem>>, vector<2x4xf32>
    tpu.vector_store %arg15[%c13, %c0_37], %49 {strides = array<i32>} : memref<15x4xf32, #tpu.memory_space<vmem>>, vector<2x4xf32>,
    %c2_38 = arith.constant 2 : index
    %c0_39 = arith.constant 0 : index
    %52 = vector.load %arg15[%c2_38, %c0_39] : memref<15x4xf32, #tpu.memory_space<vmem>>, vector<11x4xf32>
    tpu.vector_store %arg15[%c2_38, %c0_39], %45 {strides = array<i32>} : memref<15x4xf32, #tpu.memory_space<vmem>>, vector<11x4xf32>,
    %c0_40 = arith.constant 0 : index
    %c0_41 = arith.constant 0 : index
    %53 = tpu.strided_load %arg15[%c0_40, %c0_41] {strides = array<i32: 3, 1>} : memref<15x4xf32, #tpu.memory_space<vmem>>, vector<4x4xf32>
    %c0_42 = arith.constant 0 : index
    %c0_43 = arith.constant 0 : index
    %c0_44 = arith.constant 0 : index
    %54 = vector.load %arg3[%c0_42, %c0_43, %c0_44] : memref<5x4x8xf32, #tpu.memory_space<vmem>>, vector<1x4x8xf32>
    %55 = vector.shape_cast %54 : vector<1x4x8xf32> to vector<4x8xf32>
    %cst_45 = arith.constant dense<0.000000e+00> : vector<4x8xf32>
    %56 = tpu.matmul %53, %55, %cst_45 {dimension_numbers = #tpu.dot_dimension_numbers<[1], [0], [0], [1], [0, 0, 1, 1], [], []>} : vector<4x4xf32>, vector<4x8xf32>, vector<4x8xf32> -> vector<4x8xf32>
    %c1_46 = arith.constant 1 : index
    %c0_47 = arith.constant 0 : index
    %57 = tpu.strided_load %arg15[%c1_46, %c0_47] {strides = array<i32: 3, 1>} : memref<15x4xf32, #tpu.memory_space<vmem>>, vector<4x4xf32>
    %c1_48 = arith.constant 1 : index
    %c0_49 = arith.constant 0 : index
    %c0_50 = arith.constant 0 : index
    %58 = vector.load %arg3[%c1_48, %c0_49, %c0_50] : memref<5x4x8xf32, #tpu.memory_space<vmem>>, vector<1x4x8xf32>
    %59 = vector.shape_cast %58 : vector<1x4x8xf32> to vector<4x8xf32>
    %cst_51 = arith.constant dense<0.000000e+00> : vector<4x8xf32>
    %60 = tpu.matmul %57, %59, %cst_51 {dimension_numbers = #tpu.dot_dimension_numbers<[1], [0], [0], [1], [0, 0, 1, 1], [], []>} : vector<4x4xf32>, vector<4x8xf32>, vector<4x8xf32> -> vector<4x8xf32>
    %61 = arith.addf %56, %60 : vector<4x8xf32>
    %c2_52 = arith.constant 2 : index
    %c0_53 = arith.constant 0 : index
    %62 = tpu.strided_load %arg15[%c2_52, %c0_53] {strides = array<i32: 3, 1>} : memref<15x4xf32, #tpu.memory_space<vmem>>, vector<4x4xf32>
    %c2_54 = arith.constant 2 : index
    %c0_55 = arith.constant 0 : index
    %c0_56 = arith.constant 0 : index
    %63 = vector.load %arg3[%c2_54, %c0_55, %c0_56] : memref<5x4x8xf32, #tpu.memory_space<vmem>>, vector<1x4x8xf32>
    %64 = vector.shape_cast %63 : vector<1x4x8xf32> to vector<4x8xf32>
    %cst_57 = arith.constant dense<0.000000e+00> : vector<4x8xf32>
    %65 = tpu.matmul %62, %64, %cst_57 {dimension_numbers = #tpu.dot_dimension_numbers<[1], [0], [0], [1], [0, 0, 1, 1], [], []>} : vector<4x4xf32>, vector<4x8xf32>, vector<4x8xf32> -> vector<4x8xf32>
    %66 = arith.addf %61, %65 : vector<4x8xf32>
    %c3_58 = arith.constant 3 : index
    %c0_59 = arith.constant 0 : index
    %67 = tpu.strided_load %arg15[%c3_58, %c0_59] {strides = array<i32: 3, 1>} : memref<15x4xf32, #tpu.memory_space<vmem>>, vector<4x4xf32>
    %c3_60 = arith.constant 3 : index
    %c0_61 = arith.constant 0 : index
    %c0_62 = arith.constant 0 : index
    %68 = vector.load %arg3[%c3_60, %c0_61, %c0_62] : memref<5x4x8xf32, #tpu.memory_space<vmem>>, vector<1x4x8xf32>
    %69 = vector.shape_cast %68 : vector<1x4x8xf32> to vector<4x8xf32>
    %cst_63 = arith.constant dense<0.000000e+00> : vector<4x8xf32>
    %70 = tpu.matmul %67, %69, %cst_63 {dimension_numbers = #tpu.dot_dimension_numbers<[1], [0], [0], [1], [0, 0, 1, 1], [], []>} : vector<4x4xf32>, vector<4x8xf32>, vector<4x8xf32> -> vector<4x8xf32>
    %71 = arith.addf %66, %70 : vector<4x8xf32>
    %c4_64 = arith.constant 4 : index
    %c0_65 = arith.constant 0 : index
    %72 = tpu.strided_load %arg15[%c4_64, %c0_65] {strides = array<i32: 3, 1>} : memref<15x4xf32, #tpu.memory_space<vmem>>, vector<4x4xf32>
    %c4_66 = arith.constant 4 : index
    %c0_67 = arith.constant 0 : index
    %c0_68 = arith.constant 0 : index
    %73 = vector.load %arg3[%c4_66, %c0_67, %c0_68] : memref<5x4x8xf32, #tpu.memory_space<vmem>>, vector<1x4x8xf32>
    %74 = vector.shape_cast %73 : vector<1x4x8xf32> to vector<4x8xf32>
    %cst_69 = arith.constant dense<0.000000e+00> : vector<4x8xf32>
    %75 = tpu.matmul %72, %74, %cst_69 {dimension_numbers = #tpu.dot_dimension_numbers<[1], [0], [0], [1], [0, 0, 1, 1], [], []>} : vector<4x4xf32>, vector<4x8xf32>, vector<4x8xf32> -> vector<4x8xf32>
    %76 = arith.addf %71, %75 : vector<4x8xf32>
    %c0_70 = arith.constant 0 : index
    %c0_71 = arith.constant 0 : index
    %77 = vector.load %arg7[%c0_70, %c0_71] : memref<1x8xf32, #tpu.memory_space<vmem>>, vector<1x8xf32>
    %78 = vector.broadcast %77 : vector<1x8xf32> to vector<4x8xf32>
    %79 = arith.addf %76, %78 : vector<4x8xf32>
    %cst_72 = arith.constant 1.000000e-01 : f32
    %80 = vector.broadcast %cst_72 : f32 to vector<4x8xf32>
    %81 = arith.mulf %80, %79 : vector<4x8xf32>
    %82 = arith.maximumf %79, %81 : vector<4x8xf32>
    %c0_73 = arith.constant 0 : index
    %c0_74 = arith.constant 0 : index
    %c0_75 = arith.constant 0 : index
    %83 = vector.load %arg11[%c0_73, %c0_74, %c0_75] : memref<1x4x8xf32, #tpu.memory_space<vmem>>, vector<1x4x8xf32>
    %84 = vector.shape_cast %83 : vector<1x4x8xf32> to vector<4x8xf32>
    %85 = vector.shape_cast %82 : vector<4x8xf32> to vector<1x4x8xf32>
    tpu.vector_store %arg11[%c0_73, %c0_74, %c0_75], %85 {strides = array<i32>} : memref<1x4x8xf32, #tpu.memory_space<vmem>>, vector<1x4x8xf32>,
    %cst_76 = arith.constant 0.000000e+00 : f32
    %86 = vector.broadcast %cst_76 : f32 to vector<2x8xf32>
    %c0_77 = arith.constant 0 : index
    %c0_78 = arith.constant 0 : index
    %87 = vector.load %arg16[%c0_77, %c0_78] : memref<8x8xf32, #tpu.memory_space<vmem>>, vector<2x8xf32>
    tpu.vector_store %arg16[%c0_77, %c0_78], %86 {strides = array<i32>} : memref<8x8xf32, #tpu.memory_space<vmem>>, vector<2x8xf32>,
    %c6 = arith.constant 6 : index
    %c0_79 = arith.constant 0 : index
    %88 = vector.load %arg16[%c6, %c0_79] : memref<8x8xf32, #tpu.memory_space<vmem>>, vector<2x8xf32>
    tpu.vector_store %arg16[%c6, %c0_79], %86 {strides = array<i32>} : memref<8x8xf32, #tpu.memory_space<vmem>>, vector<2x8xf32>,
    %c2_80 = arith.constant 2 : index
    %c0_81 = arith.constant 0 : index
    %89 = vector.load %arg16[%c2_80, %c0_81] : memref<8x8xf32, #tpu.memory_space<vmem>>, vector<4x8xf32>
    tpu.vector_store %arg16[%c2_80, %c0_81], %82 {strides = array<i32>} : memref<8x8xf32, #tpu.memory_space<vmem>>, vector<4x8xf32>,
    %c0_82 = arith.constant 0 : index
    %c0_83 = arith.constant 0 : index
    %90 = tpu.strided_load %arg16[%c0_82, %c0_83] {strides = array<i32: 3, 1>} : memref<8x8xf32, #tpu.memory_space<vmem>>, vector<2x8xf32>
    %c0_84 = arith.constant 0 : index
    %c0_85 = arith.constant 0 : index
    %c0_86 = arith.constant 0 : index
    %91 = vector.load %arg4[%c0_84, %c0_85, %c0_86] : memref<5x8x16xf32, #tpu.memory_space<vmem>>, vector<1x8x16xf32>
    %92 = vector.shape_cast %91 : vector<1x8x16xf32> to vector<8x16xf32>
    %cst_87 = arith.constant dense<0.000000e+00> : vector<2x16xf32>
    %93 = tpu.matmul %90, %92, %cst_87 {dimension_numbers = #tpu.dot_dimension_numbers<[1], [0], [0], [1], [0, 0, 1, 1], [], []>} : vector<2x8xf32>, vector<8x16xf32>, vector<2x16xf32> -> vector<2x16xf32>
    %c1_88 = arith.constant 1 : index
    %c0_89 = arith.constant 0 : index
    %94 = tpu.strided_load %arg16[%c1_88, %c0_89] {strides = array<i32: 3, 1>} : memref<8x8xf32, #tpu.memory_space<vmem>>, vector<2x8xf32>
    %c1_90 = arith.constant 1 : index
    %c0_91 = arith.constant 0 : index
    %c0_92 = arith.constant 0 : index
    %95 = vector.load %arg4[%c1_90, %c0_91, %c0_92] : memref<5x8x16xf32, #tpu.memory_space<vmem>>, vector<1x8x16xf32>
    %96 = vector.shape_cast %95 : vector<1x8x16xf32> to vector<8x16xf32>
    %cst_93 = arith.constant dense<0.000000e+00> : vector<2x16xf32>
    %97 = tpu.matmul %94, %96, %cst_93 {dimension_numbers = #tpu.dot_dimension_numbers<[1], [0], [0], [1], [0, 0, 1, 1], [], []>} : vector<2x8xf32>, vector<8x16xf32>, vector<2x16xf32> -> vector<2x16xf32>
    %98 = arith.addf %93, %97 : vector<2x16xf32>
    %c2_94 = arith.constant 2 : index
    %c0_95 = arith.constant 0 : index
    %99 = tpu.strided_load %arg16[%c2_94, %c0_95] {strides = array<i32: 3, 1>} : memref<8x8xf32, #tpu.memory_space<vmem>>, vector<2x8xf32>
    %c2_96 = arith.constant 2 : index
    %c0_97 = arith.constant 0 : index
    %c0_98 = arith.constant 0 : index
    %100 = vector.load %arg4[%c2_96, %c0_97, %c0_98] : memref<5x8x16xf32, #tpu.memory_space<vmem>>, vector<1x8x16xf32>
    %101 = vector.shape_cast %100 : vector<1x8x16xf32> to vector<8x16xf32>
    %cst_99 = arith.constant dense<0.000000e+00> : vector<2x16xf32>
    %102 = tpu.matmul %99, %101, %cst_99 {dimension_numbers = #tpu.dot_dimension_numbers<[1], [0], [0], [1], [0, 0, 1, 1], [], []>} : vector<2x8xf32>, vector<8x16xf32>, vector<2x16xf32> -> vector<2x16xf32>
    %103 = arith.addf %98, %102 : vector<2x16xf32>
    %c3_100 = arith.constant 3 : index
    %c0_101 = arith.constant 0 : index
    %104 = tpu.strided_load %arg16[%c3_100, %c0_101] {strides = array<i32: 3, 1>} : memref<8x8xf32, #tpu.memory_space<vmem>>, vector<2x8xf32>
    %c3_102 = arith.constant 3 : index
    %c0_103 = arith.constant 0 : index
    %c0_104 = arith.constant 0 : index
    %105 = vector.load %arg4[%c3_102, %c0_103, %c0_104] : memref<5x8x16xf32, #tpu.memory_space<vmem>>, vector<1x8x16xf32>
    %106 = vector.shape_cast %105 : vector<1x8x16xf32> to vector<8x16xf32>
    %cst_105 = arith.constant dense<0.000000e+00> : vector<2x16xf32>
    %107 = tpu.matmul %104, %106, %cst_105 {dimension_numbers = #tpu.dot_dimension_numbers<[1], [0], [0], [1], [0, 0, 1, 1], [], []>} : vector<2x8xf32>, vector<8x16xf32>, vector<2x16xf32> -> vector<2x16xf32>
    %108 = arith.addf %103, %107 : vector<2x16xf32>
    %c4_106 = arith.constant 4 : index
    %c0_107 = arith.constant 0 : index
    %109 = tpu.strided_load %arg16[%c4_106, %c0_107] {strides = array<i32: 3, 1>} : memref<8x8xf32, #tpu.memory_space<vmem>>, vector<2x8xf32>
    %c4_108 = arith.constant 4 : index
    %c0_109 = arith.constant 0 : index
    %c0_110 = arith.constant 0 : index
    %110 = vector.load %arg4[%c4_108, %c0_109, %c0_110] : memref<5x8x16xf32, #tpu.memory_space<vmem>>, vector<1x8x16xf32>
    %111 = vector.shape_cast %110 : vector<1x8x16xf32> to vector<8x16xf32>
    %cst_111 = arith.constant dense<0.000000e+00> : vector<2x16xf32>
    %112 = tpu.matmul %109, %111, %cst_111 {dimension_numbers = #tpu.dot_dimension_numbers<[1], [0], [0], [1], [0, 0, 1, 1], [], []>} : vector<2x8xf32>, vector<8x16xf32>, vector<2x16xf32> -> vector<2x16xf32>
    %113 = arith.addf %108, %112 : vector<2x16xf32>
    %c0_112 = arith.constant 0 : index
    %c0_113 = arith.constant 0 : index
    %114 = vector.load %arg8[%c0_112, %c0_113] : memref<1x16xf32, #tpu.memory_space<vmem>>, vector<1x16xf32>
    %115 = vector.broadcast %114 : vector<1x16xf32> to vector<2x16xf32>
    %116 = arith.addf %113, %115 : vector<2x16xf32>
    %cst_114 = arith.constant 1.000000e-01 : f32
    %117 = vector.broadcast %cst_114 : f32 to vector<2x16xf32>
    %118 = arith.mulf %117, %116 : vector<2x16xf32>
    %119 = arith.maximumf %116, %118 : vector<2x16xf32>
    %c0_115 = arith.constant 0 : index
    %c0_116 = arith.constant 0 : index
    %c0_117 = arith.constant 0 : index
    %120 = vector.load %arg12[%c0_115, %c0_116, %c0_117] : memref<1x2x16xf32, #tpu.memory_space<vmem>>, vector<1x2x16xf32>
    %121 = vector.shape_cast %120 : vector<1x2x16xf32> to vector<2x16xf32>
    %122 = vector.shape_cast %119 : vector<2x16xf32> to vector<1x2x16xf32>
    tpu.vector_store %arg12[%c0_115, %c0_116, %c0_117], %122 {strides = array<i32>} : memref<1x2x16xf32, #tpu.memory_space<vmem>>, vector<1x2x16xf32>,
    %cst_118 = arith.constant 0.000000e+00 : f32
    %123 = vector.broadcast %cst_118 : f32 to vector<1x16xf32>
    %c0_119 = arith.constant 0 : index
    %c0_120 = arith.constant 0 : index
    %124 = vector.load %arg17[%c0_119, %c0_120] : memref<4x16xf32, #tpu.memory_space<vmem>>, vector<1x16xf32>
    tpu.vector_store %arg17[%c0_119, %c0_120], %123 {strides = array<i32>} : memref<4x16xf32, #tpu.memory_space<vmem>>, vector<1x16xf32>,
    %c3_121 = arith.constant 3 : index
    %c0_122 = arith.constant 0 : index
    %125 = vector.load %arg17[%c3_121, %c0_122] : memref<4x16xf32, #tpu.memory_space<vmem>>, vector<1x16xf32>
    tpu.vector_store %arg17[%c3_121, %c0_122], %123 {strides = array<i32>} : memref<4x16xf32, #tpu.memory_space<vmem>>, vector<1x16xf32>,
    %c1_123 = arith.constant 1 : index
    %c0_124 = arith.constant 0 : index
    %126 = vector.load %arg17[%c1_123, %c0_124] : memref<4x16xf32, #tpu.memory_space<vmem>>, vector<2x16xf32>
    tpu.vector_store %arg17[%c1_123, %c0_124], %119 {strides = array<i32>} : memref<4x16xf32, #tpu.memory_space<vmem>>, vector<2x16xf32>,
    %c0_125 = arith.constant 0 : index
    %c0_126 = arith.constant 0 : index
    %127 = vector.load %arg17[%c0_125, %c0_126] : memref<4x16xf32, #tpu.memory_space<vmem>>, vector<2x16xf32>
    %c0_127 = arith.constant 0 : index
    %c0_128 = arith.constant 0 : index
    %c0_129 = arith.constant 0 : index
    %128 = vector.load %arg5[%c0_127, %c0_128, %c0_129] : memref<3x16x1xf32, #tpu.memory_space<vmem>>, vector<1x16x1xf32>
    %129 = vector.shape_cast %128 : vector<1x16x1xf32> to vector<16x1xf32>
    %cst_130 = arith.constant dense<0.000000e+00> : vector<2x1xf32>
    %130 = tpu.matmul %127, %129, %cst_130 {dimension_numbers = #tpu.dot_dimension_numbers<[1], [0], [0], [1], [0, 0, 1, 1], [], []>} : vector<2x16xf32>, vector<16x1xf32>, vector<2x1xf32> -> vector<2x1xf32>
    %c1_131 = arith.constant 1 : index
    %c0_132 = arith.constant 0 : index
    %131 = vector.load %arg17[%c1_131, %c0_132] : memref<4x16xf32, #tpu.memory_space<vmem>>, vector<2x16xf32>
    %c1_133 = arith.constant 1 : index
    %c0_134 = arith.constant 0 : index
    %c0_135 = arith.constant 0 : index
    %132 = vector.load %arg5[%c1_133, %c0_134, %c0_135] : memref<3x16x1xf32, #tpu.memory_space<vmem>>, vector<1x16x1xf32>
    %133 = vector.shape_cast %132 : vector<1x16x1xf32> to vector<16x1xf32>
    %cst_136 = arith.constant dense<0.000000e+00> : vector<2x1xf32>
    %134 = tpu.matmul %131, %133, %cst_136 {dimension_numbers = #tpu.dot_dimension_numbers<[1], [0], [0], [1], [0, 0, 1, 1], [], []>} : vector<2x16xf32>, vector<16x1xf32>, vector<2x1xf32> -> vector<2x1xf32>
    %135 = arith.addf %130, %134 : vector<2x1xf32>
    %c2_137 = arith.constant 2 : index
    %c0_138 = arith.constant 0 : index
    %136 = vector.load %arg17[%c2_137, %c0_138] : memref<4x16xf32, #tpu.memory_space<vmem>>, vector<2x16xf32>
    %c2_139 = arith.constant 2 : index
    %c0_140 = arith.constant 0 : index
    %c0_141 = arith.constant 0 : index
    %137 = vector.load %arg5[%c2_139, %c0_140, %c0_141] : memref<3x16x1xf32, #tpu.memory_space<vmem>>, vector<1x16x1xf32>
    %138 = vector.shape_cast %137 : vector<1x16x1xf32> to vector<16x1xf32>
    %cst_142 = arith.constant dense<0.000000e+00> : vector<2x1xf32>
    %139 = tpu.matmul %136, %138, %cst_142 {dimension_numbers = #tpu.dot_dimension_numbers<[1], [0], [0], [1], [0, 0, 1, 1], [], []>} : vector<2x16xf32>, vector<16x1xf32>, vector<2x1xf32> -> vector<2x1xf32>
    %140 = arith.addf %135, %139 : vector<2x1xf32>
    %c0_143 = arith.constant 0 : index
    %c0_144 = arith.constant 0 : index
    %141 = vector.load %arg9[%c0_143, %c0_144] : memref<1x1xf32, #tpu.memory_space<vmem>>, vector<1x1xf32>
    %142 = vector.broadcast %141 : vector<1x1xf32> to vector<2x1xf32>
    %143 = arith.addf %140, %142 : vector<2x1xf32>
    %c0_145 = arith.constant 0 : index
    %c0_146 = arith.constant 0 : index
    %c0_147 = arith.constant 0 : index
    %144 = vector.load %arg13[%c0_145, %c0_146, %c0_147] : memref<1x2x1xf32, #tpu.memory_space<vmem>>, vector<1x2x1xf32>
    %145 = vector.shape_cast %144 : vector<1x2x1xf32> to vector<2x1xf32>
    %146 = vector.shape_cast %143 : vector<2x1xf32> to vector<1x2x1xf32>
    tpu.vector_store %arg13[%c0_145, %c0_146, %c0_147], %146 {strides = array<i32>} : memref<1x2x1xf32, #tpu.memory_space<vmem>>, vector<1x2x1xf32>,
    return
  }
  func.func @transform_0(%arg0: i32) -> (i32, i32, i32) {
    %c0_i32 = arith.constant 0 : i32
    %c0_i32_0 = arith.constant 0 : i32
    %c0_i32_1 = arith.constant 0 : i32
    return %arg0, %c0_i32, %c0_i32_0 : i32, i32, i32
  }
  func.func @transform_1(%arg0: i32) -> (i32, i32, i32) {
    %c0_i32 = arith.constant 0 : i32
    %c0_i32_0 = arith.constant 0 : i32
    %c0_i32_1 = arith.constant 0 : i32
    %c0_i32_2 = arith.constant 0 : i32
    return %c0_i32, %c0_i32_0, %c0_i32_1 : i32, i32, i32
  }
  func.func @transform_2(%arg0: i32) -> (i32, i32, i32) {
    %c0_i32 = arith.constant 0 : i32
    %c0_i32_0 = arith.constant 0 : i32
    %c0_i32_1 = arith.constant 0 : i32
    %c0_i32_2 = arith.constant 0 : i32
    return %c0_i32, %c0_i32_0, %c0_i32_1 : i32, i32, i32
  }
  func.func @transform_3(%arg0: i32) -> (i32, i32, i32) {
    %c0_i32 = arith.constant 0 : i32
    %c0_i32_0 = arith.constant 0 : i32
    %c0_i32_1 = arith.constant 0 : i32
    %c0_i32_2 = arith.constant 0 : i32
    return %c0_i32, %c0_i32_0, %c0_i32_1 : i32, i32, i32
  }
  func.func @transform_4(%arg0: i32) -> (i32, i32, i32) {
    %c0_i32 = arith.constant 0 : i32
    %c0_i32_0 = arith.constant 0 : i32
    %c0_i32_1 = arith.constant 0 : i32
    %c0_i32_2 = arith.constant 0 : i32
    return %c0_i32, %c0_i32_0, %c0_i32_1 : i32, i32, i32
  }
  func.func @transform_5(%arg0: i32) -> (i32, i32) {
    %c0_i32 = arith.constant 0 : i32
    %c0_i32_0 = arith.constant 0 : i32
    %c0_i32_1 = arith.constant 0 : i32
    return %c0_i32, %c0_i32_0 : i32, i32
  }
  func.func @transform_6(%arg0: i32) -> (i32, i32) {
    %c0_i32 = arith.constant 0 : i32
    %c0_i32_0 = arith.constant 0 : i32
    %c0_i32_1 = arith.constant 0 : i32
    return %c0_i32, %c0_i32_0 : i32, i32
  }
  func.func @transform_7(%arg0: i32) -> (i32, i32) {
    %c0_i32 = arith.constant 0 : i32
    %c0_i32_0 = arith.constant 0 : i32
    %c0_i32_1 = arith.constant 0 : i32
    return %c0_i32, %c0_i32_0 : i32, i32
  }
  func.func @transform_8(%arg0: i32) -> (i32, i32) {
    %c0_i32 = arith.constant 0 : i32
    %c0_i32_0 = arith.constant 0 : i32
    %c0_i32_1 = arith.constant 0 : i32
    return %c0_i32, %c0_i32_0 : i32, i32
  }
  func.func @transform_9(%arg0: i32) -> (i32, i32, i32) {
    %c0_i32 = arith.constant 0 : i32
    %c0_i32_0 = arith.constant 0 : i32
    %c0_i32_1 = arith.constant 0 : i32
    return %arg0, %c0_i32, %c0_i32_0 : i32, i32, i32
  }
  func.func @transform_10(%arg0: i32) -> (i32, i32, i32) {
    %c0_i32 = arith.constant 0 : i32
    %c0_i32_0 = arith.constant 0 : i32
    %c0_i32_1 = arith.constant 0 : i32
    return %arg0, %c0_i32, %c0_i32_0 : i32, i32, i32
  }
  func.func @transform_11(%arg0: i32) -> (i32, i32, i32) {
    %c0_i32 = arith.constant 0 : i32
    %c0_i32_0 = arith.constant 0 : i32
    %c0_i32_1 = arith.constant 0 : i32
    return %arg0, %c0_i32, %c0_i32_0 : i32, i32, i32
  }
  func.func @transform_12(%arg0: i32) -> (i32, i32, i32) {
    %c0_i32 = arith.constant 0 : i32
    %c0_i32_0 = arith.constant 0 : i32
    %c0_i32_1 = arith.constant 0 : i32
    return %arg0, %c0_i32, %c0_i32_0 : i32, i32, i32
  }
}

</mosaic_0001>

<bundles_post_ra>
// kernel: period_discriminator_forward.1
= control target key start
LH: loop header
LB: loop body
LE: loop exit
PB: predicated region body
PF: predicated region fallthrough
CT: control target
= control target key end

     0   :  { %s2079_s23 = smov 0   ;;  %s2251_s0 = inlined_call_operand.vmem [shape: f32[8,32,1], index: 0, kind: input, shape index: {}]   ;;  %s2252_s1 = inlined_call_operand.vmem [shape: f32[5,1,4], index: 1, kind: input, shape index: {}]   ;;  %s2253_s2 = inlined_call_operand.vmem [shape: f32[5,4,8], index: 2, kind: input, shape index: {}]   ;;  %s2254_s3 = inlined_call_operand.vmem [shape: f32[5,8,16], index: 3, kind: input, shape index: {}]   ;;  %s2255_s4 = inlined_call_operand.vmem [shape: f32[3,16,1], index: 4, kind: input, shape index: {}]   ;;  %s2256_s5 = inlined_call_operand.vmem [shape: f32[1,4], index: 5, kind: input, shape index: {}]   ;;  %s2257_s6 = inlined_call_operand.vmem [shape: f32[1,8], index: 6, kind: input, shape index: {}]   ;;  %s2258_s7 = inlined_call_operand.vmem [shape: f32[1,16], index: 7, kind: input, shape index: {}]   ;;  %s2259_s8 = inlined_call_operand.<no memory space> [shape: f32[1,1], index: 8, kind: input, shape index: {}]   ;;  %s2260_s9 = inlined_call_operand.vmem [shape: f32[8,11,4], index: 9, kind: output, shape index: {0}]   ;;  %s2261_s10 = inlined_call_operand.vmem [shape: f32[8,4,8], index: 10, kind: output, shape index: {1}]   ;;  %s2262_s11 = inlined_call_operand.vmem [shape: f32[8,2,16], index: 11, kind: output, shape index: {2}]   ;;  %s2263_s12 = inlined_call_operand.vmem [shape: f32[8,2,1], index: 12, kind: output, shape index: {3}]  }
   0x1   :  { %v18_v0 = vstv %s2259_s8 }
   0x2   :  { %19 = vst [vmem:[#allocation6] sm:$0x1] %v18_v0 }
   0x3 LB: > { %s1817_s24 = sadd.s32 4294967295, %s2005_s23   ;;  %p1821_p0 = scmp.ge.s32.totalorder %s2005_s23, 1  ;;  %s2005_s23 = sphi %s2079_s23, %s25_s23  }
   0x4   : > { %p371_p1 = scmp.lt.s32.totalorder %s2005_s23, 9 }
   0x6   : > { %p372_p2 = pnand %p1821_p0, %p371_p1 }
   0x7   : > { %p425_p3 = scmp.lt.s32.totalorder (!%p372_p2), %s1817_s24, 7  ;;  %vm451_vm0 = vcmask (!%p372_p2), 1024   ;;  %v2007_v1 = vmov (!%p372_p2), 0   ;;  %v2008_v2 = vmov (!%p372_p2), 0.0   ;;  %vm454_vm1 = vcmask (!%p372_p2), 7168  }
   0x8   : > { %375 = sbr.rel (%p372_p2) target bundleno = 884 (0x374), region = 56  ;;  %1998 = vset.pattern.permute.xlu1 (!%p372_p2), %v2007_v1  ;;  %1997 = vset.pattern.permute.xlu0 (!%p372_p2), %v2007_v1  ;;  %452 = vst.msk [vmem:[#allocation2] sm:$0x3] (!%p372_p2), %vm451_vm0, %v2008_v2  ;;  %453 = vst.msk [vmem:[#allocation2 + $0x22] sm:$0x3] (!%p372_p2), %vm451_vm0, %v2008_v2  ;;  %vm602_vm2 = vcmask (!%p372_p2), 25600  }
   0x9   : > { %1905 = vmatprep.subr.mxu0 (!%p372_p2), %v2008_v2  ;;  %1910 = vmatprep.subr.mxu1 (!%p372_p2), %v2008_v2  ;;  %v1839_v17 = vld [vmem:[%s2253_s2 + $0x4] sm:$0xf] (!%p372_p2)  ;;  %vm616_vm3 = vcmask (!%p372_p2), 1043456   ;;  %v608_v18 = vld [vmem:[%s2253_s2] sm:$0xf] (!%p372_p2)  ;;  %vm2009_vm4 = vmmov (!%p372_p2), 0  }
   0xa   : > { %603 = vst.msk [vmem:[#allocation3] sm:$0x3] (!%p372_p2), %vm602_vm2, %v2008_v2  ;;  %604 = vst.msk [vmem:[#allocation3 + $0xd] sm:$0x3] (!%p372_p2), %vm602_vm2, %v2008_v2  ;;  %1906 = vmatpush3.msk.msra.mxu0 (!%p372_p2), %vm616_vm3, %v1839_v17  ;;  %1907 = vmatprep.mubr.msk.f32.mxu0 (!%p372_p2), %vm2009_vm4, %v2008_v2  ;;  %v1831_v23 = vld [vmem:[%s2252_s1 + $0x1] ss:$0 sm:$0xff] (!%p372_p2) }
   0xb   : > { %1911 = vmatpush3.msk.msra.mxu1 (!%p372_p2), %vm616_vm3, %v608_v18  ;;  %1912 = vmatprep.mubr.msk.f32.mxu1 (!%p372_p2), %vm2009_vm4, %v2008_v2  ;;  %v1829_v24 = vld [vmem:[%s2252_s1] ss:$0 sm:$0xff] (!%p372_p2)  ;;  %v1833_v25 = vld [vmem:[%s2252_s1 + $0x2] ss:$0 sm:$0xff] (!%p372_p2)  ;;  %v1835_v32 = vld [vmem:[%s2252_s1 + $0x3] ss:$0 sm:$0xff] (!%p372_p2) }
   0xc   : > { %1915 = vmatprep.subr.mxu0 (!%p372_p2), %v2008_v2  ;;  %1920 = vmatprep.subr.mxu1 (!%p372_p2), %v2008_v2  ;;  %v1837_v41 = vld [vmem:[%s2252_s1 + $0x4] ss:$0 sm:$0xff] (!%p372_p2)  ;;  %v1838_v50 = vld [vmem:[%s2256_s5] ss:$0 sm:$0xff] (!%p372_p2)  ;;  %vm600_vm5 = vcmask (!%p372_p2), 26624   ;;  %vm598_vm6 = vcmask (!%p372_p2), 31744  }
   0xd   : > { %v1844_v59 = vld [vmem:[%s2253_s2 + $0x8] sm:$0xf] (!%p372_p2)  ;;  %v1847_v60 = vld [vmem:[%s2253_s2 + $0xc] sm:$0xf] (!%p372_p2)  ;;  %v1850_v63 = vld [vmem:[%s2253_s2 + $0x10] sm:$0xf] (!%p372_p2) }
   0xe   : > { %vm1021_vm7 = vcmask (!%p372_p2), 58368   ;;  %v1853_v18 = vld [vmem:[%s2257_s6] ss:$0 sm:$0xff] (!%p372_p2)  ;;  %vm1019_vm8 = vcmask (!%p372_p2), 60416   ;;  %vm1031_vm9 = vcmask (!%p372_p2), 64512   ;;  %vm1424_vm10 = vcmask (!%p372_p2), 122880  }
   0xf   : > { %s2265_s24 = smov (!%p425_p3, %s1817_s24), 7  ;;  %1022 = vst.msk [vmem:[#allocation4] sm:$0x3] %vm1021_vm7, %v2008_v2  ;;  %1023 = vst.msk [vmem:[#allocation4 + $0x6] sm:$0x3] %vm1021_vm7, %v2008_v2  ;;  %vm1422_vm11 = vcmask 123904  }
  0x10   : > { %s1874_s8 = sshll.u32 %s2265_s24, 5  ;;  %s1826_s26 = sshll.u32 %s2265_s24, 2  ;;  %1425 = vst.msk [vmem:[#allocation5] sm:$0x1] %vm1424_vm10, %v2008_v2  ;;  %1426 = vst.msk [vmem:[#allocation5 + $0x3] sm:$0x1] %vm1424_vm10, %v2008_v2 }
  0x11   : > { %s429_s27 = scalar_lea.vmem %s2251_s0, %s1874_s8  ;;  %s438_s29 = scalar_lea.vmem %s2261_s10, %s1826_s26  ;;  %vm1435_vm12 = vcmask 130048  }
  0x12   : > { %v447_v3 = vld [vmem:[%s429_s27] sm:$0xff]  ;;  %v448_v4 = vld [vmem:[%s429_s27 + $0x8] sm:$0xff]  ;;  %v449_v5 = vld [vmem:[%s429_s27 + $0x10] sm:$0xff] }
  0x13   : > { %455 = vst.msk [vmem:[#allocation2 + $0x2] sm:$0xff] %vm454_vm1, %v447_v3  ;;  %456 = vst.msk [vmem:[#allocation2 + $0xa] sm:$0xff] %vm454_vm1, %v448_v4  ;;  %v450_v6 = vld [vmem:[%s429_s27 + $0x18] sm:$0xff]  ;;  %s1875_s27 = sshll.u32 %s2265_s24, 4  ;;  %v1854_v4 = vld [vmem:[%s2254_s3 + $0x8] sm:$0xff] }
  0x14   : > { %457 = vst.msk [vmem:[#allocation2 + $0x12] sm:$0xff] %vm454_vm1, %v449_v5  ;;  %458 = vst.msk [vmem:[#allocation2 + $0x1a] sm:$0xff] %vm454_vm1, %v450_v6  ;;  %s434_s30 = scalar_lea.vmem %s2260_s9, %s1875_s27  ;;  %v1026_v5 = vld [vmem:[%s2254_s3] sm:$0xff] }
  0x1b   : > { %v482_v7 = vld [vmem:[#allocation2 + $0x1] ss:$3 sm:$0xff]  ;;  %v459_v8 = vld [vmem:[#allocation2] ss:$3 sm:$0xff]  ;;  %v508_v12 = vld [vmem:[#allocation2 + $0x2] ss:$3 sm:$0xff] }
  0x1c   : > { %489 = vperm.xlu1 %1998, %v482_v7   ;;  %465 = vperm.xlu0 %1997, %v459_v8   ;;  %v484_v9 = vld [vmem:[#allocation2 + $0x19] ss:$3 sm:$0x7]  ;;  %v461_v10 = vld [vmem:[#allocation2 + $0x18] ss:$3 sm:$0x7] }
  0x1d   : > { %v510_v11 = vld [vmem:[#allocation2 + $0x1a] ss:$3 sm:$0x7]  ;;  %v536_v13 = vld [vmem:[#allocation2 + $0x1b] ss:$3 sm:$0x7] }
  0x1e   : > { %v534_v14 = vld [vmem:[#allocation2 + $0x3] ss:$3 sm:$0xff]  ;;  %v562_v15 = vld [vmem:[#allocation2 + $0x1c] ss:$3 sm:$0x7] }
  0x1f   : > { %v560_v16 = vld [vmem:[#allocation2 + $0x4] ss:$3 sm:$0xff] }
  0x20   : > { %494 = vperm.xlu1 %1998, %v484_v9   ;;  %470 = vperm.xlu0 %1997, %v461_v10  }
  0x24   : > { %520 = vperm.xlu1 %1998, %v510_v11   ;;  %515 = vperm.xlu0 %1997, %v508_v12  }
  0x28   : > { %546 = vperm.xlu1 %1998, %v536_v13   ;;  %541 = vperm.xlu0 %1997, %v534_v14  }
  0x2c   : > { %572 = vperm.xlu1 %1998, %v562_v15   ;;  %567 = vperm.xlu0 %1997, %v560_v16  }
  0x9b   : > { %v490_v19 = vpop.permute.xlu1 %489  ;;  %v466_v20 = vpop.permute.xlu0 %465 }
  0x9c   : > { %v503_v28 = vmul.f32 %v1831_v23, %v490_v19  ;;  %v479_v29 = vmul.f32 %v1829_v24, %v466_v20 }
  0x9e   : > { %v505_v37 = vadd.f32 %v503_v28, %v479_v29  ;;  %v1861_v28 = vld [vmem:[%s2254_s3 + $0x20] sm:$0xff] }
  0x9f   : > { %v495_v21 = vpop.permute.xlu1 %494  ;;  %v471_v22 = vpop.permute.xlu0 %470 }
  0xa0   : > { %v504_v30 = vmul.f32 %v1831_v23, %v495_v21  ;;  %v480_v31 = vmul.f32 %v1829_v24, %v471_v22  ;;  %v1857_v24 = vld [vmem:[%s2254_s3 + $0x10] sm:$0xff] }
  0xa2   : > { %v506_v38 = vadd.f32 %v504_v30, %v480_v31 }
  0xa3   : > { %v521_v26 = vpop.permute.xlu1 %520  ;;  %v516_v27 = vpop.permute.xlu0 %515 }
  0xa4   : > { %v530_v33 = vmul.f32 %v1833_v25, %v521_v26  ;;  %v529_v34 = vmul.f32 %v1833_v25, %v516_v27  ;;  %v1859_v25 = vld [vmem:[%s2254_s3 + $0x18] sm:$0xff] }
  0xa6   : > { %v532_v42 = vadd.f32 %v530_v33, %v506_v38  ;;  %v531_v43 = vadd.f32 %v529_v34, %v505_v37  ;;  %v1865_v33 = vld [vmem:[%s2255_s4 + $0x18] sm:$0xff]  ;;  %v1429_v34 = vld [vmem:[%s2255_s4] sm:$0xff]  ;;  %v1430_v37 = vld [vmem:[%s2255_s4 + $0x8] sm:$0xff] }
  0xa7   : > { %v547_v35 = vpop.permute.xlu1 %546  ;;  %v542_v36 = vpop.permute.xlu0 %541  ;;  %v1980_v38 = vpack.c.bf16 %v1430_v37, %v1429_v34 }
  0xa8   : > { %v556_v39 = vmul.f32 %v1835_v32, %v547_v35  ;;  %v555_v40 = vmul.f32 %v1835_v32, %v542_v36  ;;  %v1864_v32 = vld [vmem:[%s2255_s4 + $0x10] sm:$0xff]  ;;  %v2010_v35 = vmov 0.0|0.0  }
  0xa9   : > { %v1977_v36 = vpack.c.bf16 %v1865_v33, %v1864_v32 }
  0xaa   : > { %v558_v46 = vadd.f32 %v556_v39, %v532_v42  ;;  %v557_v47 = vadd.f32 %v555_v40, %v531_v43 }
  0xab   : > { %v573_v44 = vpop.permute.xlu1 %572  ;;  %v568_v45 = vpop.permute.xlu0 %567 }
  0xac   : > { %v582_v48 = vmul.f32 %v1837_v41, %v573_v44  ;;  %v581_v49 = vmul.f32 %v1837_v41, %v568_v45 }
  0xae   : > { %v584_v51 = vadd.f32 %v582_v48, %v558_v46  ;;  %v583_v52 = vadd.f32 %v581_v49, %v557_v47 }
  0xb0   : > { %v593_v53 = vadd.f32 %v1838_v50, %v584_v51  ;;  %v592_v54 = vadd.f32 %v1838_v50, %v583_v52  ;;  %v1863_v51 = vld [vmem:[%s2258_s7] ss:$0 sm:$0xff] }
  0xb2   : > { %v595_v55 = vmul.f32 0.1, %v593_v53  ;;  %v594_v56 = vmul.f32 0.1, %v592_v54 }
  0xb4   : > { %v597_v57 = vmax.f32 %v593_v53, %v595_v55  ;;  %v596_v58 = vmax.f32 %v592_v54, %v594_v56 }
  0xb6   : > { %601 = vst.msk [vmem:[%s434_s30 + $0x8] sm:$0x7] %vm600_vm5, %v597_v57  ;;  %606 = vst.msk [vmem:[#allocation3 + $0xa] sm:$0x7] %vm600_vm5, %v597_v57  ;;  %v1868_v57 = vld [vmem:[%s2255_s4 + $0x20] sm:$0xff] }
  0xb7   : > { %599 = vst.msk [vmem:[%s434_s30] sm:$0xff] %vm598_vm6, %v596_v58  ;;  %605 = vst.msk [vmem:[#allocation3 + $0x2] sm:$0xff] %vm598_vm6, %v596_v58  ;;  %v1869_v58 = vld [vmem:[%s2255_s4 + $0x28] sm:$0xff] }
  0xbe   : > { %v610_v61 = vld [vmem:[#allocation3 + $0x1] ss:$3 sm:$0xf]  ;;  %v607_v62 = vld [vmem:[#allocation3] ss:$3 sm:$0xf] }
  0xbf   : > { %1908 = vmatmul.mubr.msk.f32.vlgmr.msra.gmra.mrb[0].mxu0 %vm598_vm6, %v610_v61  ;;  %1913 = vmatmul.mubr.msk.f32.vlgmr.msra.gmra.mrb[0].mxu1 %vm598_vm6, %v607_v62  ;;  %v767_v0 = vld [vmem:[#allocation3 + $0x2] ss:$3 sm:$0xf]  ;;  %v848_v1 = vld [vmem:[#allocation3 + $0x3] ss:$3 sm:$0xf] }
  0xc0   : > { %1916 = vmatpush3.msk.msra.mxu0 %vm616_vm3, %v1844_v59  ;;  %1921 = vmatpush3.msk.msra.mxu1 %vm616_vm3, %v1847_v60  ;;  %v929_v3 = vld [vmem:[#allocation3 + $0x4] ss:$3 sm:$0xf]  ;;  %v1983_v59 = vpack.c.bf16 %v1869_v58, %v1868_v57 }
  0xc1   : > { %1917 = vmatprep.mubr.msk.f32.mxu0 %vm2009_vm4, %v2008_v2  ;;  %1922 = vmatprep.mubr.msk.f32.mxu1 %vm2009_vm4, %v2008_v2 }
  0xc2   : > { %1925 = vmatprep.subr.mxu0 %v2008_v2  ;;  %1930 = vmatprep.subr.mxu1 %v2008_v2 }
  0xc3   : > { %1918 = vmatmul.mubr.msk.f32.vlgmr.msra.gmra.mrb[2].mxu0 %vm598_vm6, %v767_v0  ;;  %1923 = vmatmul.mubr.msk.f32.vlgmr.msra.gmra.mrb[2].mxu1 %vm598_vm6, %v848_v1 }
  0xc4   : > { %1926 = vmatpush3.msk.msra.mxu0 %vm616_vm3, %v1850_v63  ;;  %1927 = vmatprep.mubr.msk.f32.mxu0 %vm2009_vm4, %v2008_v2 }
  0xc5   : > { %1935 = vmatprep.subr.mxu0 %v2008_v2  ;;  %1932 = vmatprep.mubr.msk.f32.mxu1 %vm2009_vm4, %v2008_v2 }
  0xc6   : > { %1931 = vmatpush3.msra.mxu1 %v1854_v4 }
  0xc7   : > { %1928 = vmatmul.mubr.msk.f32.vlgmr.msra.gmra.mrb[4].mxu0 %vm598_vm6, %v929_v3  ;;  %1940 = vmatprep.subr.mxu1 %v2008_v2 }
  0xc8   : > { %1937 = vmatprep.mubr.msk.f32.mxu0 %vm2009_vm4, %v2008_v2  ;;  %1936 = vmatpush3.msra.mxu0 %v1026_v5 }
  0xc9   : > { %1945 = vmatprep.subr.mxu0 %v2008_v2 }
 0x192   : > { %v686_v6 = vpop.f32.mrb[0].mxu0  ;;  %v762_v7 = vpop.f32.mrb[0].mxu1 }
 0x193   : > { %v763_v8 = vadd.f32 %v762_v7, %v686_v6  ;;  %v1909_v9 = vpop.f32.mrb[1].mxu0  ;;  %v1914_v10 = vpop.f32.mrb[1].mxu1  ;;  %v1871_v6 = vld [vmem:[#allocation6] ss:$0 sm:$0xff] }
 0x196   : > { %v842_v11 = vpop.f32.mrb[2].mxu0  ;;  %v923_v12 = vpop.f32.mrb[2].mxu1 }
 0x197   : > { %v846_v13 = vadd.f32 %v842_v11, %v763_v8  ;;  %v1919_v14 = vpop.f32.mrb[3].mxu0  ;;  %v1924_v15 = vpop.f32.mrb[3].mxu1 }
 0x199   : > { %v927_v16 = vadd.f32 %v923_v12, %v846_v13 }
 0x19a   : > { %v1004_v17 = vpop.f32.mrb[4].mxu0 }
 0x19b   : > { %v1008_v19 = vadd.f32 %v1004_v17, %v927_v16  ;;  %v1929_v20 = vpop.f32.mrb[5].mxu0 }
 0x19d   : > { %v1016_v21 = vadd.f32 %v1853_v18, %v1008_v19 }
 0x19f   : > { %v1017_v22 = vmul.f32 0.1, %v1016_v21 }
 0x1a1   : > { %v1018_v23 = vmax.f32 %v1016_v21, %v1017_v22 }
 0x1a3   : > { %1020 = vst.msk [vmem:[%s438_s29] sm:$0xf] %vm1019_vm8, %v1018_v23  ;;  %1024 = vst.msk [vmem:[#allocation4 + $0x2] sm:$0xf] %vm1019_vm8, %v1018_v23  ;;  %s1827_s29 = sshll.u32 %s2265_s24, 1 }
 0x1a4   : > { %s442_s14 = scalar_lea.vmem %s2262_s11, %s1827_s29  ;;  %s446_s21 = scalar_lea.vmem %s2263_s12, %s1827_s29 }
 0x1aa   : > { %v1028_v26 = vld [vmem:[#allocation4 + $0x1] ss:$3 sm:$0x3]  ;;  %v1025_v27 = vld [vmem:[#allocation4] ss:$3 sm:$0x3] }
 0x1ab   : > { %1933 = vmatmul.mubr.msk.f32.vlgmr.msra.gmra.mrb[4].mxu1 %vm1031_vm9, %v1028_v26  ;;  %1938 = vmatmul.mubr.msk.f32.vlgmr.msra.gmra.mrb[6].mxu0 %vm1031_vm9, %v1025_v27  ;;  %v1179_v29 = vld [vmem:[#allocation4 + $0x2] ss:$3 sm:$0x3]  ;;  %v1257_v30 = vld [vmem:[#allocation4 + $0x3] ss:$3 sm:$0x3] }
 0x1ac   : > { %1941 = vmatpush3.msra.mxu1 %v1857_v24  ;;  %1946 = vmatpush3.msra.mxu0 %v1859_v25  ;;  %v1335_v31 = vld [vmem:[#allocation4 + $0x4] ss:$3 sm:$0x3] }
 0x1ad   : > { %1942 = vmatprep.mubr.msk.f32.mxu1 %vm2009_vm4, %v2008_v2  ;;  %1947 = vmatprep.mubr.msk.f32.mxu0 %vm2009_vm4, %v2008_v2 }
 0x1ae   : > { %1950 = vmatprep.subr.mxu1 %v2008_v2  ;;  %1976 = vmatprep.subr.bf16.mxu0 %v2010_v35 }
 0x1af   : > { %1943 = vmatmul.mubr.msk.f32.vlgmr.msra.gmra.mrb[6].mxu1 %vm1031_vm9, %v1179_v29  ;;  %1948 = vmatmul.mubr.msk.f32.vlgmr.msra.gmra.mrb[8].mxu0 %vm1031_vm9, %v1257_v30 }
 0x1b0   : > { %1951 = vmatpush3.msra.mxu1 %v1861_v28  ;;  %1952 = vmatprep.mubr.msk.f32.mxu1 %vm2009_vm4, %v2008_v2 }
 0x1b1   : > { %1959 = vmatprep.mubr.msk.f32.mxu0 %vm2009_vm4, %v2008_v2  ;;  %1979 = vmatprep.subr.bf16.mxu1 %v2010_v35 }
 0x1b2   : > { %1978 = vmatpush3.bf16.msra.mxu0 %v1977_v36 }
 0x1b3   : > { %1953 = vmatmul.mubr.msk.f32.vlgmr.msra.gmra.mrb[8].mxu1 %vm1031_vm9, %v1335_v31  ;;  %1982 = vmatprep.subr.bf16.mxu0 %v2010_v35 }
 0x1b4   : > { %1966 = vmatprep.mubr.msk.f32.mxu1 %vm2009_vm4, %v2008_v2  ;;  %1981 = vmatpush3.bf16.msra.mxu1 %v1980_v38 }
 0x27e   : > { %v1101_v39 = vpop.f32.mrb[4].mxu1  ;;  %v1174_v40 = vpop.f32.mrb[6].mxu0 }
 0x27f   : > { %v1175_v41 = vadd.f32 %v1174_v40, %v1101_v39  ;;  %v1934_v42 = vpop.f32.mrb[5].mxu1  ;;  %v1939_v43 = vpop.f32.mrb[7].mxu0 }
 0x282   : > { %v1251_v44 = vpop.f32.mrb[6].mxu1  ;;  %v1329_v45 = vpop.f32.mrb[8].mxu0 }
 0x283   : > { %v1255_v46 = vadd.f32 %v1251_v44, %v1175_v41  ;;  %v1944_v47 = vpop.f32.mrb[7].mxu1  ;;  %v1949_v48 = vpop.f32.mrb[9].mxu0 }
 0x285   : > { %v1333_v49 = vadd.f32 %v1329_v45, %v1255_v46 }
 0x286   : > { %v1407_v50 = vpop.f32.mrb[8].mxu1 }
 0x287   : > { %v1411_v52 = vadd.f32 %v1407_v50, %v1333_v49  ;;  %v1954_v53 = vpop.f32.mrb[9].mxu1 }
 0x289   : > { %v1419_v54 = vadd.f32 %v1863_v51, %v1411_v52 }
 0x28b   : > { %v1420_v55 = vmul.f32 0.1, %v1419_v54 }
 0x28d   : > { %v1421_v56 = vmax.f32 %v1419_v54, %v1420_v55 }
 0x28f   : > { %1423 = vst.msk [vmem:[%s442_s14] sm:$0x3] %vm1422_vm11, %v1421_v56  ;;  %1427 = vst.msk [vmem:[#allocation5 + $0x1] sm:$0x3] %vm1422_vm11, %v1421_v56 }
 0x296   : > { %v1431_v60 = vld [vmem:[#allocation5 + $0x1] sm:$0x3] }
 0x297   : > { %v1428_v61 = vld [vmem:[#allocation5] sm:$0x3]  ;;  %1960 = vmatmul.mubr.msk.f32.vlgmr.msra.gmra.mrb[10].mxu0 %vm1435_vm12, %v1431_v60  ;;  %v1582_v62 = vld [vmem:[#allocation5 + $0x2] sm:$0x3] }
 0x298   : > { %1967 = vmatmul.mubr.msk.f32.vlgmr.msra.gmra.mrb[10].mxu1 %vm1435_vm12, %v1428_v61  ;;  %1984 = vmatpush3.bf16.msra.mxu0 %v1983_v59 }
 0x299   : > { %1973 = vmatprep.mubr.msk.f32.mxu0 %vm2009_vm4, %v2008_v2 }
 0x29b   : > { %1974 = vmatmul.mubr.msk.f32.vlgmr.msra.gmra.mrb[12].mxu0 %vm1435_vm12, %v1582_v62 }
 0x36a   : > { %v1505_v63 = vpop.f32.mrb[10].mxu0 }
 0x36b   : > { %v1578_v0 = vpop.f32.mrb[10].mxu1  ;;  %v1961_v3 = vpop.f32.mrb[11].mxu0 }
 0x36c   : > { %v1579_v1 = vadd.f32 %v1578_v0, %v1505_v63  ;;  %v1968_v4 = vpop.f32.mrb[11].mxu1 }
 0x36e   : > { %v1655_v5 = vpop.f32.mrb[12].mxu0 }
 0x36f   : > { %v1659_v7 = vadd.f32 %v1655_v5, %v1579_v1  ;;  %v1975_v8 = vpop.f32.mrb[13].mxu0 }
 0x371   : > { %v1667_v9 = vadd.f32 %v1871_v6, %v1659_v7 }
 0x373   : > { %1668 = vst.msk [vmem:[%s446_s21] sm:$0x3] %vm451_vm0, %v1667_v9 }
 0x374 PF: > { %s25_s23 = sadd.s32 1, %s2005_s23  }
 0x375   : > { %p22_p4 = scmp.ge.s32.totalorder %s25_s23, 10  }
 0x377   :  { %24 = sbr.rel (!%p22_p4) target bundleno = 3 (0x3), region = 153 }

</bundles_post_ra>
